<compile_context>
chip_gen: v7x
topology: tpu7x:2x2x1
jax: 0.10.0
libtpu: 0.0.40
codegen_flags: <defaults>
</compile_context>

<pallas_src>
import jax
import jax.numpy as jnp
from jax.experimental import pallas as pl
from jax.experimental.pallas import tpu as pltpu


def _round_up(x, m):
    return ((x + m - 1) // m) * m


# --------------------------------------------------------------------------
# Kernels
# --------------------------------------------------------------------------
def _linear_temp_kernel_single_k(x_ref, w_ref, b_ref, tinv_ref, o_ref):
    """One (TM, TN) output tile, full K reduction in a single MXU pass."""
    acc = jnp.dot(x_ref[...], w_ref[...], preferred_element_type=jnp.float32)
    o_ref[...] = (acc + b_ref[...]) * tinv_ref[0, 0]


def _linear_temp_kernel_multi_k(x_ref, w_ref, b_ref, tinv_ref, o_ref):
    """K-tiled variant. Accumulates directly into the resident f32 output tile.

    NOTE: correctness requires the K axis to be the LAST (innermost) grid axis
    — the epilogue fires on the final K step of each (i, j) tile.
    """
    k = pl.program_id(2)

    @pl.when(k == 0)
    def _():
        o_ref[...] = jnp.zeros_like(o_ref)

    o_ref[...] += jnp.dot(x_ref[...], w_ref[...],
                          preferred_element_type=jnp.float32)

    @pl.when(k == pl.num_programs(2) - 1)
    def _():
        # logits = acc + bias ; out = logits * (1/temperature)
        o_ref[...] = (o_ref[...] + b_ref[...]) * tinv_ref[0, 0]


# --------------------------------------------------------------------------
# One-time parameter preparation (hoisted out of the per-call hot path)
# --------------------------------------------------------------------------
def prepare_linear_params(w, b, temperature):
    """Pad + cast the (static) classifier weights once.

    w: [H, C] f32, b: [C] f32, temperature: scalar.
    Returns a dict with bf16 lane-dense padded W, f32 padded bias, and the
    precomputed SMEM scalar 1/temperature.
    """
    H, C = w.shape
    H_pad = _round_up(H, 128)
    C_pad = _round_up(C, 128)

    w_p = w.astype(jnp.bfloat16)
    if (H_pad, C_pad) != (H, C):
        w_p = jnp.pad(w_p, ((0, H_pad - H), (0, C_pad - C)))

    b_p = b.astype(jnp.float32)
    if C_pad != C:
        b_p = jnp.pad(b_p, (0, C_pad - C))
    b_p = b_p.reshape(1, C_pad)

    t_inv = (1.0 / jnp.asarray(temperature, jnp.float32)).reshape(1, 1)
    return {"w": w_p, "b": b_p, "t_inv": t_inv, "H": H, "C": C}


# --------------------------------------------------------------------------
# Forward
# --------------------------------------------------------------------------
def model_with_temperature_forward(x, params, *, tm=None, tn=None, tk=None):
    """out = (x @ W + b) / temperature, x: [B, H] (params from prepare_linear_params)."""
    B, H = x.shape
    assert H == params["H"], (H, params["H"])
    w_p, b_p, t_inv = params["w"], params["b"], params["t_inv"]
    H_pad, C_pad = w_p.shape
    C = params["C"]

    # ---- tile selection ----------------------------------------------------
    # TM: multiple of 16 (bf16 sublane packing), capped at 256.
    TM = tm if tm is not None else min(256, _round_up(B, 16))
    TM = _round_up(TM, 16)
    B_pad = _round_up(B, TM)

    # TN: largest 128-multiple divisor of C_pad (<= 512)  -> minimal N steps.
    if tn is not None:
        TN = tn
    else:
        TN = 128
        for cand in range(128, min(C_pad, 512) + 1, 128):
            if C_pad % cand == 0:
                TN = cand
    assert C_pad % TN == 0 and TN % 128 == 0

    # TK: largest 128-multiple divisor of H_pad whose double-buffered tiles
    # fit the VMEM budget (prefer TK == H_pad -> single K step, no scratch).
    VMEM_BUDGET = 24 * 1024 * 1024   # safe on v7x (32 MiB scoped default)

    def footprint(tk_):
        # 2x double-buffered bf16 inputs + 2x double-buffered f32 output + bias.
        return (2 * (TM * tk_ + tk_ * TN) * 2
                + 2 * TM * TN * 4
                + 2 * TN * 4)

    if tk is not None:
        TK = tk
    else:
        TK = 128
        cand = H_pad
        while cand >= 128:
            if H_pad % cand == 0 and cand % 128 == 0 and footprint(cand) <= VMEM_BUDGET:
                TK = cand
                break
            cand -= 128
    assert H_pad % TK == 0 and TK % 128 == 0
    n_k = H_pad // TK

    # ---- per-call activation padding / cast (weights already prepared) -----
    x_p = x.astype(jnp.bfloat16)
    if (B_pad, H_pad) != (B, H):
        x_p = jnp.pad(x_p, ((0, B_pad - B), (0, H_pad - H)))

    cost = pl.CostEstimate(
        flops=2 * B_pad * H_pad * C_pad,
        transcendentals=0,
        bytes_accessed=(2 * (B_pad * H_pad + H_pad * C_pad)   # bf16 streams
                        + 4 * (B_pad * C_pad + C_pad) + 4),   # f32 out + bias
    )
    out_shape = jax.ShapeDtypeStruct((B_pad, C_pad), jnp.float32)

    if n_k == 1:
        out_pad = pl.pallas_call(
            _linear_temp_kernel_single_k,
            out_shape=out_shape,
            grid_spec=pltpu.PrefetchScalarGridSpec(
                num_scalar_prefetch=0,
                grid=(B_pad // TM, C_pad // TN),
                in_specs=[
                    pl.BlockSpec((TM, H_pad), lambda i, j: (i, 0)),    # activations
                    pl.BlockSpec((H_pad, TN), lambda i, j: (0, j)),    # weights
                    pl.BlockSpec((1, TN), lambda i, j: (0, j)),        # bias
                    pl.BlockSpec(memory_space=pltpu.MemorySpace.SMEM), # 1/temperature
                ],
                out_specs=pl.BlockSpec((TM, TN), lambda i, j: (i, j)),
            ),
            compiler_params=pltpu.CompilerParams(
                dimension_semantics=("parallel", "parallel"),
                vmem_limit_bytes=32 * 1024 * 1024,
            ),
            cost_estimate=cost,
        )(x_p, w_p, b_p, t_inv)
    else:
        # K axis must stay last/innermost ("arbitrary") — epilogue fires on the
        # final K step of each (i, j) output tile.
        out_pad = pl.pallas_call(
            _linear_temp_kernel_multi_k,
            out_shape=out_shape,
            grid_spec=pltpu.PrefetchScalarGridSpec(
                num_scalar_prefetch=0,
                grid=(B_pad // TM, C_pad // TN, n_k),
                in_specs=[
                    pl.BlockSpec((TM, TK), lambda i, j, k: (i, k)),       # activations
                    pl.BlockSpec((TK, TN), lambda i, j, k: (k, j)),       # weights
                    pl.BlockSpec((1, TN), lambda i, j, k: (0, j)),        # bias
                    pl.BlockSpec(memory_space=pltpu.MemorySpace.SMEM),    # 1/temperature
                ],
                out_specs=pl.BlockSpec((TM, TN), lambda i, j, k: (i, j)),
            ),
            compiler_params=pltpu.CompilerParams(
                dimension_semantics=("parallel", "parallel", "arbitrary"),
                vmem_limit_bytes=32 * 1024 * 1024,
            ),
            cost_estimate=cost,
        )(x_p, w_p, b_p, t_inv)

    if (B_pad, C_pad) != (B, C):
        return out_pad[:B, :C]
    return out_pad


# --------------------------------------------------------------------------
# References
# --------------------------------------------------------------------------
def reference_forward(x, w, b, temperature, cast_dtype=None):
    if cast_dtype is not None:
        x = x.astype(cast_dtype).astype(jnp.float32)
        w = w.astype(cast_dtype).astype(jnp.float32)
    logits = x @ w + b[None, :]
    return logits / temperature


if __name__ == "__main__":
    key = jax.random.PRNGKey(0)
    kx, kw, kb, kx2, kw2, kb2 = jax.random.split(key, 6)

    temperature = jnp.float32(1.5)            # nn.Parameter(torch.ones(1) * 1.5)

    # ---- small shape (single-K fast path) ----------------------------------
    B, H, C = 8, 32, 16
    x = jax.random.normal(kx, (B, H), dtype=jnp.float32)
    w = jax.random.normal(kw, (H, C), dtype=jnp.float32) * 0.1
    b = jax.random.normal(kb, (C,), dtype=jnp.float32) * 0.01

    params = prepare_linear_params(w, b, temperature)       # hoisted, called once
    out = jax.block_until_ready(model_with_temperature_forward(x, params))
    assert out.shape == (B, C)
    ref_bf = reference_forward(x, w, b, temperature, cast_dtype=jnp.bfloat16)
    ref_f32 = reference_forward(x, w, b, temperature)
    assert jnp.allclose(out, ref_bf, atol=1e-3, rtol=1e-3), "mismatch vs bf16 ref (small)"
    assert jnp.allclose(out, ref_f32, atol=5e-2, rtol=5e-2), "mismatch vs f32 ref (small)"

    # ---- larger shape: exercises lane padding + single-K collapsed grid ----
    B2, H2, C2 = 16, 1152, 384
    x2 = jax.random.normal(kx2, (B2, H2), dtype=jnp.float32)
    w2 = jax.random.normal(kw2, (H2, C2), dtype=jnp.float32) * 0.05
    b2 = jax.random.normal(kb2, (C2,), dtype=jnp.float32) * 0.01

    params2 = prepare_linear_params(w2, b2, temperature)
    out2 = jax.block_until_ready(model_with_temperature_forward(x2, params2))
    assert out2.shape == (B2, C2)
    ref2_bf = reference_forward(x2, w2, b2, temperature, cast_dtype=jnp.bfloat16)
    ref2_f32 = reference_forward(x2, w2, b2, temperature)
    assert jnp.allclose(out2, ref2_bf, atol=2e-3, rtol=2e-3), "mismatch vs bf16 ref (big)"
    assert jnp.allclose(out2, ref2_f32, atol=1e-1, rtol=5e-2), "mismatch vs f32 ref (big)"

    # ---- force the K-tiled accumulator path (tk override) ------------------
    out3 = jax.block_until_ready(
        model_with_temperature_forward(x2, params2, tk=384, tn=128))
    assert out3.shape == (B2, C2)
    assert jnp.allclose(out3, ref2_bf, atol=2e-3, rtol=2e-3), "mismatch vs bf16 ref (multi-K)"

    print("KERNEL_OK")
</pallas_src>

<mosaic_0001>
module attributes {stable_mosaic.version = 11 : i64} {
  func.func @_linear_temp_kernel_single_k(%arg0: i32, %arg1: i32, %arg2: memref<16x128xbf16, #tpu.memory_space<vmem>>, %arg3: memref<128x128xbf16, #tpu.memory_space<vmem>>, %arg4: memref<1x128xf32, #tpu.memory_space<vmem>>, %arg5: memref<1x1xf32, #tpu.memory_space<smem>>, %arg6: memref<16x128xf32, #tpu.memory_space<vmem>>) attributes {dimension_semantics = [#tpu.dimension_semantics<parallel>, #tpu.dimension_semantics<parallel>], iteration_bounds = array<i64: 1, 1>, scalar_prefetch = 0 : i64, scratch_operands = 0 : i64, tpu.core_type = #tpu.core_type<tc>, window_params = [{transform_indices = @transform_0, window_bounds = array<i64: 16, 128>}, {transform_indices = @transform_1, window_bounds = array<i64: 128, 128>}, {transform_indices = @transform_2, window_bounds = array<i64: 1, 128>}, {transform_indices = @transform_3, window_bounds = array<i64: 1, 1>}, {transform_indices = @transform_4, window_bounds = array<i64: 16, 128>}]} {
    %c0 = arith.constant 0 : index
    %c0_0 = arith.constant 0 : index
    %0 = vector.load %arg2[%c0, %c0_0] : memref<16x128xbf16, #tpu.memory_space<vmem>>, vector<16x128xbf16>
    %c0_1 = arith.constant 0 : index
    %c0_2 = arith.constant 0 : index
    %1 = vector.load %arg3[%c0_1, %c0_2] : memref<128x128xbf16, #tpu.memory_space<vmem>>, vector<128x128xbf16>
    %cst = arith.constant dense<0.000000e+00> : vector<16x128xf32>
    %2 = tpu.matmul %0, %1, %cst {dimension_numbers = #tpu.dot_dimension_numbers<[1], [0], [0], [1], [0, 0, 1, 1], [], []>} : vector<16x128xbf16>, vector<128x128xbf16>, vector<16x128xf32> -> vector<16x128xf32>
    %c0_3 = arith.constant 0 : index
    %c0_4 = arith.constant 0 : index
    %3 = vector.load %arg4[%c0_3, %c0_4] : memref<1x128xf32, #tpu.memory_space<vmem>>, vector<1x128xf32>
    %4 = vector.broadcast %3 : vector<1x128xf32> to vector<16x128xf32>
    %5 = arith.addf %2, %4 : vector<16x128xf32>
    %c0_5 = arith.constant 0 : index
    %c0_6 = arith.constant 0 : index
    %6 = memref.load %arg5[%c0_5, %c0_6] : memref<1x1xf32, #tpu.memory_space<smem>>
    %7 = vector.broadcast %6 : f32 to vector<16x128xf32>
    %8 = arith.mulf %5, %7 : vector<16x128xf32>
    %c0_7 = arith.constant 0 : index
    %c0_8 = arith.constant 0 : index
    %9 = vector.load %arg6[%c0_7, %c0_8] : memref<16x128xf32, #tpu.memory_space<vmem>>, vector<16x128xf32>
    tpu.vector_store %arg6[%c0_7, %c0_8], %8 {strides = array<i32>} : memref<16x128xf32, #tpu.memory_space<vmem>>, vector<16x128xf32>,
    return
  }
  func.func @transform_0(%arg0: i32, %arg1: i32) -> (i32, i32) {
    %c0_i32 = arith.constant 0 : i32
    %c0_i32_0 = arith.constant 0 : i32
    return %arg0, %c0_i32 : i32, i32
  }
  func.func @transform_1(%arg0: i32, %arg1: i32) -> (i32, i32) {
    %c0_i32 = arith.constant 0 : i32
    %c0_i32_0 = arith.constant 0 : i32
    return %c0_i32, %arg1 : i32, i32
  }
  func.func @transform_2(%arg0: i32, %arg1: i32) -> (i32, i32) {
    %c0_i32 = arith.constant 0 : i32
    %c0_i32_0 = arith.constant 0 : i32
    return %c0_i32, %arg1 : i32, i32
  }
  func.func @transform_3(%arg0: i32, %arg1: i32) -> (i32, i32) {
    %c0_i32 = arith.constant 0 : i32
    %c0_i32_0 = arith.constant 0 : i32
    %c0_i32_1 = arith.constant 0 : i32
    return %c0_i32, %c0_i32_0 : i32, i32
  }
  func.func @transform_4(%arg0: i32, %arg1: i32) -> (i32, i32) {
    %c0_i32 = arith.constant 0 : i32
    return %arg0, %arg1 : i32, i32
  }
}

</mosaic_0001>

<bundles_post_ra>
// kernel: tpu_custom_call.1
= control target key start
LH: loop header
LB: loop body
LE: loop exit
PB: predicated region body
PF: predicated region fallthrough
CT: control target
= control target key end

     0   :  { %10 = vsyncpa [#allocation4], 0  ;;  %s397_s0 = inlined_call_operand.hbm [shape: bf16[16,128], index: 0, kind: input, shape index: {}]   ;;  %s398_s1 = inlined_call_operand.hbm [shape: bf16[128,128], index: 1, kind: input, shape index: {}]   ;;  %s399_s2 = inlined_call_operand.vmem [shape: f32[1,128], index: 2, kind: input, shape index: {}]   ;;  %s400_s3 = inlined_call_operand.<no memory space> [shape: f32[1,1], index: 3, kind: input, shape index: {}]   ;;  %s401_s4 = inlined_call_operand.hbm [shape: f32[16,128], index: 4, kind: output, shape index: {}]  }
   0x1   :  { %11 = vsyncpa [#allocation7], 0 }
   0x2   :  { %12 = vsyncpa [#allocation5], 0  ;;  %s321_s15 = smov [#allocation3]   ;;  %s249_s19 = scalar_lea.hbm %s397_s0, 128 }
   0x3   :  { %s18_s16 = sshll.u32 %s321_s15, 4  ;;  %p250_p0 = scmp.ne.s32.totalorder %s397_s0, %s249_s19  ;;  %s19_s16 = int_to_ptr.vmem [resolvable:$true] %s18_s16 }
   0x4   :  { %p253_p1 = scmp.lt.u32.totalorder %s249_s19, %s397_s0 }
   0x6   :  { %p255_p2 = pnand %p253_p1, %p250_p0 }
   0x8   :  { %258 = shalt.err (!%p255_p2)
}
   0x9   :  { %s259_s24 = scalar_lea.vmem %s19_s16, 128  ;;  %p264_p4 = scmp.lt.s32.totalorder %s19_s16, %s19_s16 }
   0xa   :  { %p260_p3 = scmp.ne.s32.totalorder %s19_s16, %s259_s24  ;;  %p265_p5 = scmp.lt.s32.totalorder %s259_s24, %s259_s24 }
   0xc   :  { %p266_p6 = por %p265_p5, %p264_p4 }
   0xe   :  { %p267_p7 = pnand %p266_p6, %p260_p3 }
  0x10   :  { %270 = shalt.err (!%p267_p7)
}
  0x11   :  { %s322_s25 = smov 64   ;;  %s323_s26 = smov 4  }
  0x12   :  { %24 = dma.hbm_to_vmem [thread:$0]  %s397_s0, 128, %s19_s16, [#allocation4], %s322_s25, %s322_s25, %s323_s26  }
  0x13   :  { %s324_s29 = smov [#allocation6]   ;;  %s271_s7 = scalar_lea.hbm %s398_s1, 1024 }
  0x14   :  { %s30_s30 = sshll.u32 %s324_s29, 4  ;;  %p272_p8 = scmp.ne.s32.totalorder %s398_s1, %s271_s7  ;;  %s31_s30 = int_to_ptr.vmem [resolvable:$true] %s30_s30 }
  0x15   :  { %p275_p9 = scmp.lt.u32.totalorder %s271_s7, %s398_s1 }
  0x17   :  { %p277_p10 = pnand %p275_p9, %p272_p8 }
  0x19   :  { %280 = shalt.err (!%p277_p10)
}
  0x1a   :  { %s281_s12 = scalar_lea.vmem %s31_s30, 1024  ;;  %p286_p12 = scmp.lt.s32.totalorder %s31_s30, %s31_s30 }
  0x1b   :  { %p282_p11 = scmp.ne.s32.totalorder %s31_s30, %s281_s12  ;;  %p287_p13 = scmp.lt.s32.totalorder %s281_s12, %s281_s12 }
  0x1d   :  { %p288_p0 = por %p287_p13, %p286_p12 }
  0x1f   :  { %p289_p1 = pnand %p288_p0, %p282_p11 }
  0x21   :  { %292 = shalt.err (!%p289_p1)
}
  0x22   :  { %36 = dma.hbm_to_vmem [thread:$0]  %s398_s1, 1024, %s31_s30, [#allocation7], %s322_s25, %s322_s25, %s323_s26  }
  0x23   :  { %315 = dma.done.wait [#allocation4], 128  }
  0x24   :  { %316 = vsyncadd [#allocation4], 4294967168 }
  0x25   :  { %317 = dma.done.wait [#allocation7], 1024  }
  0x26   :  { %318 = vsyncadd [#allocation7], 4294966272  ;;  %v325_v0 = vmov 0.0   ;;  %vm326_vm0 = vmmov 0   ;;  %v240_v1 = vld [vmem:[#allocation6] sm:$0xff]   ;;  %v241_v2 = vld [vmem:[#allocation6 + $0x8] sm:$0xff]   ;;  %v169_v12 = vstv %s400_s3 }
  0x27   :  { %211 = vmatprep.subr.bf16.mxu0 %v325_v0  ;;  %227 = vmatprep.mubr.msk.bf16.mxu0 %vm326_vm0, %v325_v0  ;;  %v242_v3 = vld [vmem:[#allocation6 + $0x10] sm:$0xff]   ;;  %v243_v4 = vld [vmem:[#allocation6 + $0x18] sm:$0xff]   ;;  %v244_v5 = vld [vmem:[#allocation6 + $0x20] sm:$0xff]   ;;  %s327_s17 = smov [#allocation8]  }
  0x28   :  { %212 = vmatpush3.bf16.msra.mxu0 %v240_v1  ;;  %v245_v6 = vld [vmem:[#allocation6 + $0x28] sm:$0xff]   ;;  %v246_v7 = vld [vmem:[#allocation6 + $0x30] sm:$0xff]   ;;  %v247_v8 = vld [vmem:[#allocation6 + $0x38] sm:$0xff]   ;;  %s179_s18 = sshll.u32 %s327_s17, 4  ;;  %s180_s18 = int_to_ptr.vmem [resolvable:$true] %s179_s18 }
  0x29   :  { %213 = vmatprep.subr.bf16.mxu0 %v325_v0  ;;  %v248_v9 = vld [vmem:[#allocation3] sm:$0xff]   ;;  %s293_s19 = scalar_lea.vmem %s180_s18, 256  ;;  %p298_p3 = scmp.lt.s32.totalorder %s180_s18, %s180_s18 }
  0x2a   :  { %v192_v10 = vld [vmem:[%s399_s2] ss:$0 sm:$0xff]  ;;  %p294_p2 = scmp.ne.s32.totalorder %s180_s18, %s293_s19  ;;  %p299_p4 = scmp.lt.s32.totalorder %s293_s19, %s293_s19 }
  0x2c   :  { %214 = vmatpush3.bf16.msra.mxu0 %v241_v2  ;;  %p300_p5 = por %p299_p4, %p298_p3 }
  0x2d   :  { %215 = vmatprep.subr.bf16.mxu0 %v325_v0 }
  0x2e   :  { %p301_p6 = pnand %p300_p5, %p294_p2 }
  0x30   :  { %216 = vmatpush3.bf16.msra.mxu0 %v242_v3 }
  0x31   :  { %217 = vmatprep.subr.bf16.mxu0 %v325_v0 }
  0x34   :  { %218 = vmatpush3.bf16.msra.mxu0 %v243_v4 }
  0x35   :  { %219 = vmatprep.subr.bf16.mxu0 %v325_v0 }
  0x38   :  { %220 = vmatpush3.bf16.msra.mxu0 %v244_v5 }
  0x39   :  { %221 = vmatprep.subr.bf16.mxu0 %v325_v0 }
  0x3c   :  { %222 = vmatpush3.bf16.msra.mxu0 %v245_v6 }
  0x3d   :  { %223 = vmatprep.subr.bf16.mxu0 %v325_v0 }
  0x40   :  { %224 = vmatpush3.bf16.msra.mxu0 %v246_v7 }
  0x41   :  { %225 = vmatprep.subr.bf16.mxu0 %v325_v0 }
  0x44   :  { %226 = vmatpush3.bf16.msra.mxu0 %v247_v8 }
  0x47   :  { %228 = vmatmul.mubr.bf16.vlgmr.msra.gmra.mrb[0].mxu0 %v248_v9 }
 0x11a   :  { %v161_v11 = vpop.f32.mrb[0].mxu0 }
 0x11b   :  { %v162_v13 = vadd.f32 %v192_v10, %v161_v11  ;;  %v229_v14 = vpop.f32.mrb[1].mxu0 }
 0x11c   :  { %v164_v15 = vpop.f32.mrb[2].mxu0 }
 0x11d   :  { %v170_v16 = vmul.f32 %v169_v12, %v162_v13  ;;  %v165_v17 = vadd.f32 %v192_v10, %v164_v15  ;;  %v230_v18 = vpop.f32.mrb[3].mxu0 }
 0x11f   :  { %172 = vst [vmem:[#allocation8] sm:$0xff] %v170_v16  ;;  %v171_v19 = vmul.f32 %v169_v12, %v165_v17 }
 0x121   :  { %173 = vst [vmem:[#allocation8 + $0x8] sm:$0xff] %v171_v19 }
 0x122   :  { %304 = shalt.err (!%p301_p6)
}
 0x123   :  { %s305_s20 = scalar_lea.hbm %s401_s4, 256 }
 0x124   :  { %p306_p7 = scmp.ne.s32.totalorder %s401_s4, %s305_s20  ;;  %p309_p8 = scmp.lt.u32.totalorder %s305_s20, %s401_s4 }
 0x126   :  { %p311_p9 = pnand %p309_p8, %p306_p7 }
 0x128   :  { %314 = shalt.err (!%p311_p9)
}
 0x129   :  { %s328_s25 = smov 128   ;;  %s329_s26 = smov 8  }
 0x12a   :  { %185 = dma.vmem_to_hbm [thread:$0]  %s180_s18, 256, %s401_s4, [#allocation5], %s328_s25, %s328_s25, %s329_s26  }
 0x12b   :  { %319 = dma.done.wait [#allocation5], 256  }
 0x12c   :  { %320 = vsyncadd [#allocation5], 4294967040 }
 0x12d   :  { %189 = vsyncpa [#allocation4], 1 }
 0x12e   :  { %190 = vsyncpa [#allocation7], 1 }
 0x12f   :  { %191 = vsyncpa [#allocation5], 1 }

</bundles_post_ra>
